<compile_context>
chip_gen: v7x
topology: tpu7x:2x2x1
jax: 0.10.0
libtpu: 0.0.40
codegen_flags: <defaults>
</compile_context>

<pallas_src>
import functools

import jax
import jax.numpy as jnp
from jax.experimental import pallas as pl
from jax.experimental.pallas import tpu as pltpu


_MAX_TILE_ROWS = 2048  # packed rows per tile (1 packed row = FOLD tokens = 512 B f32)


def _round_up(x, m):
    return (x + m - 1) // m * m


# --------------------------------------------------------------------------
# Kernel
# --------------------------------------------------------------------------
def _ext_attn_kernel(x_ref, wk_ref, wv_ref, o_ref, *, fold):
    # x_ref : (tm4, fold*D)    packed token tile (fold tokens per 128-lane row)
    # wk_ref: (fold*D, fold*S) block-diag(fold x Wk^T), bf16, resident
    # wv_ref: (fold*S, fold*D) block-diag(fold x Wv^T), bf16, resident
    # o_ref : (tm4, fold*D)    lane-dense output tile
    s = wk_ref.shape[1] // fold
    x = x_ref[...].astype(jnp.bfloat16)

    # mm1: (tm4, fold*D) @ (fold*D, fold*S); bf16 operands, f32 MXU accumulation.
    # K = fold*D = 128 -> full-width MXU pass (vs. 32/256 before).
    attn = jnp.dot(x, wk_ref[...], preferred_element_type=jnp.float32)

    # Segmented, numerically-stable softmax: lane block [j*S, (j+1)*S) holds the
    # logits of token j within each packed row.  All slices are 128-lane aligned
    # (S is a multiple of 128); reductions / exp stay in f32 (v5e-safe), the
    # per-row normalizer uses the EUP reciprocal (approx) slot.
    probs = []
    for j in range(fold):
        a = attn[:, j * s:(j + 1) * s]
        m = jnp.max(a, axis=-1, keepdims=True)
        e = jnp.exp(a - m)
        r = pl.reciprocal(jnp.sum(e, axis=-1, keepdims=True), approx=True)
        probs.append((e * r).astype(jnp.bfloat16))
    p = probs[0] if fold == 1 else jnp.concatenate(probs, axis=-1)

    # mm2: (tm4, fold*S) @ (fold*S, fold*D) -> lane-dense (tm4, fold*D) output;
    # N = fold*D = 128, so stores are full unmasked 128-lane rows.
    out = jnp.dot(p, wv_ref[...], preferred_element_type=jnp.float32)
    o_ref[...] = out.astype(o_ref.dtype)


# --------------------------------------------------------------------------
# One-time parameter prep (hoisted out of the per-call path)
# --------------------------------------------------------------------------
def prepare_params(wk, wv):
    """wk: (S, D) = mk.weight ; wv: (D, S) = mv.weight.

    Builds lane-folded block-diagonal Wk^T (fold*D, fold*S) and Wv^T
    (fold*S, fold*D) in bf16 so the kernel can consume/produce a lane-dense
    packed token layout and run both matmuls at full MXU width.
    """
    _, d = wk.shape
    fold = 128 // d if (d < 128 and 128 % d == 0) else 1
    eye = jnp.eye(fold, dtype=wk.dtype)
    wk_bd = jnp.kron(eye, jnp.transpose(wk))   # (fold*D, fold*S)
    wv_bd = jnp.kron(eye, jnp.transpose(wv))   # (fold*S, fold*D)
    return wk_bd.astype(jnp.bfloat16), wv_bd.astype(jnp.bfloat16)


# --------------------------------------------------------------------------
# Tiling / VMEM heuristics
# --------------------------------------------------------------------------
def _pick_tile_rows(m4, cap=_MAX_TILE_ROWS):
    """Packed-row tile size (1 packed row = fold tokens = 128 f32 lanes)."""
    if m4 <= 8:
        return m4                              # single full-array block (tiny inputs)
    tm4 = min(cap, _round_up(m4, 8))
    steps = pl.cdiv(m4, tm4)
    # v7x has two TensorCores: when there is enough work, prefer an even number
    # of >=2 tiles on the "parallel" row axis so neither core idles.
    if m4 > 64:
        if steps < 2:
            steps = 2
        elif steps % 2 == 1:
            steps += 1
        tm4 = _round_up(pl.cdiv(m4, steps), 8)
    return tm4


def _vmem_limit_bytes(tm4, lanes, s4, itemsize):
    """Padding-aware VMEM budget for the lane-dense layout."""
    lanes_p = _round_up(lanes, 128)
    s4_p = _round_up(s4, 128)
    io_bytes = 2 * 2 * tm4 * lanes_p * itemsize          # x + out tiles, double-buffered
    weights_bytes = 2 * 2 * lanes_p * s4_p * 2           # 2 bf16 weights, double-buffered
    interm_bytes = tm4 * s4_p * 10 + 2 * tm4 * lanes_p * 4  # attn f32 + probs bf16 + f32 temps
    total = io_bytes + weights_bytes + interm_bytes
    # >= 32 MiB (override v5e's 16 MiB scoped default), <= 48 MiB (safe on v7x's
    # 64 MiB physical VMEM; v5e/v6e have 128 MiB physical).
    return int(min(max(int(1.5 * total), 32 << 20), 48 << 20))


# --------------------------------------------------------------------------
# Wrapper
# --------------------------------------------------------------------------
def temporal_external_attn(queries, wk_bd, wv_bd):
    """queries: (B, N, D); wk_bd/wv_bd from prepare_params (block-diag bf16)."""
    B, N, D = queries.shape
    fold = wk_bd.shape[0] // D
    s4 = wk_bd.shape[1]                   # fold * S
    lanes = fold * D                      # 128 when D divides 128
    M = B * N

    xf = queries.reshape(M, D)            # free bitcast reshape
    m_tok = _round_up(M, fold)
    if m_tok != M:
        # Rare ragged tail (< fold tokens): pad so tokens pack fold-per-lane-row.
        # TODO(synk): handle a non-multiple-of-fold token count without this HBM pad copy.
        xf = jnp.pad(xf, ((0, m_tok - M), (0, 0)))
    m4 = m_tok // fold
    xp = xf.reshape(m4, lanes)            # free bitcast reshape -> lane-dense layout

    tm4 = _pick_tile_rows(m4)
    grid = (pl.cdiv(m4, tm4),)            # ragged last tile masked by Pallas

    out_p = pl.pallas_call(
        functools.partial(_ext_attn_kernel, fold=fold),
        out_shape=jax.ShapeDtypeStruct((m4, lanes), queries.dtype),
        grid_spec=pltpu.PrefetchScalarGridSpec(
            num_scalar_prefetch=0,
            grid=grid,
            in_specs=[
                pl.BlockSpec((tm4, lanes), lambda i: (i, 0)),   # packed token tile
                pl.BlockSpec((lanes, s4), lambda i: (0, 0)),    # block-diag Wk^T (resident)
                pl.BlockSpec((s4, lanes), lambda i: (0, 0)),    # block-diag Wv^T (resident)
            ],
            out_specs=pl.BlockSpec((tm4, lanes), lambda i: (i, 0)),
        ),
        compiler_params=pltpu.CompilerParams(
            dimension_semantics=("parallel",),
            vmem_limit_bytes=_vmem_limit_bytes(
                tm4, lanes, s4, jnp.dtype(queries.dtype).itemsize),
        ),
    )(xp, wk_bd, wv_bd)

    out = out_p.reshape(m_tok, D)
    if m_tok != M:
        out = out[:M]
    return out.reshape(B, N, D)


# --------------------------------------------------------------------------
# Reference & self-test
# --------------------------------------------------------------------------
def _reference(queries, wk, wv):
    attn = jnp.einsum("bnd,sd->bns", queries, wk)
    attn = jax.nn.softmax(attn, axis=-1)
    return jnp.einsum("bns,ds->bnd", attn, wv)


if __name__ == "__main__":
    # Small shapes consistent with the module: batch=2, seq=8, d_model=32, S=256.
    B, N, D, S = 2, 8, 32, 256

    key = jax.random.PRNGKey(0)
    kq, kk, kv = jax.random.split(key, 3)

    queries = jax.random.normal(kq, (B, N, D), dtype=jnp.float32)
    # Deterministic "parameter init" mimicking nn.Linear weight shapes:
    #   mk.weight: (S, d_model), mv.weight: (d_model, S)
    wk = jax.random.normal(kk, (S, D), dtype=jnp.float32) * (1.0 / jnp.sqrt(D))
    wv = jax.random.normal(kv, (D, S), dtype=jnp.float32) * (1.0 / jnp.sqrt(S))

    # One-time weight prep (block-diag fold + bf16 cast), hoisted out of the call path.
    wk_bd, wv_bd = prepare_params(wk, wv)

    out = temporal_external_attn(queries, wk_bd, wv_bd)
    out = jax.block_until_ready(out)

    ref = _reference(queries, wk, wv)
    assert out.shape == (B, N, D)
    max_err = float(jnp.max(jnp.abs(out - ref)))
    # bf16 MXU operands + approx EUP reciprocal -> ~1e-2-level relative error.
    assert jnp.allclose(out, ref, atol=5e-3, rtol=5e-2), f"max abs err {max_err}"

    print("KERNEL_OK")
</pallas_src>

<mosaic_0001>
module attributes {stable_mosaic.version = 11 : i64} {
  func.func @_ext_attn_kernel(%arg0: i32, %arg1: memref<4x128xf32, #tpu.memory_space<vmem>>, %arg2: memref<128x1024xbf16, #tpu.memory_space<vmem>>, %arg3: memref<1024x128xbf16, #tpu.memory_space<vmem>>, %arg4: memref<4x128xf32, #tpu.memory_space<vmem>>) attributes {dimension_semantics = [#tpu.dimension_semantics<parallel>], iteration_bounds = array<i64: 1>, scalar_prefetch = 0 : i64, scratch_operands = 0 : i64, tpu.core_type = #tpu.core_type<tc>, window_params = [{transform_indices = @transform_0, window_bounds = array<i64: 4, 128>}, {pipeline_mode = #tpu.pipeline_mode<synchronous>, transform_indices = @transform_1, window_bounds = array<i64: 128, 1024>}, {pipeline_mode = #tpu.pipeline_mode<synchronous>, transform_indices = @transform_2, window_bounds = array<i64: 1024, 128>}, {transform_indices = @transform_3, window_bounds = array<i64: 4, 128>}]} {
    %c0 = arith.constant 0 : index
    %c0_0 = arith.constant 0 : index
    %0 = vector.load %arg1[%c0, %c0_0] : memref<4x128xf32, #tpu.memory_space<vmem>>, vector<4x128xf32>
    %1 = arith.truncf %0 : vector<4x128xf32> to vector<4x128xbf16>
    %c0_1 = arith.constant 0 : index
    %c0_2 = arith.constant 0 : index
    %2 = vector.load %arg2[%c0_1, %c0_2] : memref<128x1024xbf16, #tpu.memory_space<vmem>>, vector<128x1024xbf16>
    %cst = arith.constant dense<0.000000e+00> : vector<4x1024xf32>
    %3 = tpu.matmul %1, %2, %cst {dimension_numbers = #tpu.dot_dimension_numbers<[1], [0], [0], [1], [0, 0, 1, 1], [], []>} : vector<4x128xbf16>, vector<128x1024xbf16>, vector<4x1024xf32> -> vector<4x1024xf32>
    %4 = vector.extract_strided_slice %3 {offsets = [0, 0], sizes = [4, 256], strides = [1, 1]} : vector<4x1024xf32> to vector<4x256xf32>
    %cst_3 = arith.constant dense<0xFF800000> : vector<4xf32>
    %5 = vector.multi_reduction <maximumf>, %4, %cst_3 [1] : vector<4x256xf32> to vector<4xf32>
    %6 = vector.shape_cast %5 : vector<4xf32> to vector<4x1xf32>
    %7 = vector.broadcast %6 : vector<4x1xf32> to vector<4x256xf32>
    %8 = arith.subf %4, %7 : vector<4x256xf32>
    %9 = math.exp %8 : vector<4x256xf32>
    %cst_4 = arith.constant dense<0.000000e+00> : vector<4xf32>
    %10 = vector.multi_reduction <add>, %9, %cst_4 [1] : vector<4x256xf32> to vector<4xf32>
    %11 = vector.shape_cast %10 : vector<4xf32> to vector<4x1xf32>
    %12 = tpu.reciprocal %11 {approx = true} : vector<4x1xf32> -> vector<4x1xf32>
    %13 = vector.broadcast %12 : vector<4x1xf32> to vector<4x256xf32>
    %14 = arith.mulf %9, %13 : vector<4x256xf32>
    %15 = arith.truncf %14 : vector<4x256xf32> to vector<4x256xbf16>
    %16 = vector.extract_strided_slice %3 {offsets = [0, 256], sizes = [4, 256], strides = [1, 1]} : vector<4x1024xf32> to vector<4x256xf32>
    %cst_5 = arith.constant dense<0xFF800000> : vector<4xf32>
    %17 = vector.multi_reduction <maximumf>, %16, %cst_5 [1] : vector<4x256xf32> to vector<4xf32>
    %18 = vector.shape_cast %17 : vector<4xf32> to vector<4x1xf32>
    %19 = vector.broadcast %18 : vector<4x1xf32> to vector<4x256xf32>
    %20 = arith.subf %16, %19 : vector<4x256xf32>
    %21 = math.exp %20 : vector<4x256xf32>
    %cst_6 = arith.constant dense<0.000000e+00> : vector<4xf32>
    %22 = vector.multi_reduction <add>, %21, %cst_6 [1] : vector<4x256xf32> to vector<4xf32>
    %23 = vector.shape_cast %22 : vector<4xf32> to vector<4x1xf32>
    %24 = tpu.reciprocal %23 {approx = true} : vector<4x1xf32> -> vector<4x1xf32>
    %25 = vector.broadcast %24 : vector<4x1xf32> to vector<4x256xf32>
    %26 = arith.mulf %21, %25 : vector<4x256xf32>
    %27 = arith.truncf %26 : vector<4x256xf32> to vector<4x256xbf16>
    %28 = vector.extract_strided_slice %3 {offsets = [0, 512], sizes = [4, 256], strides = [1, 1]} : vector<4x1024xf32> to vector<4x256xf32>
    %cst_7 = arith.constant dense<0xFF800000> : vector<4xf32>
    %29 = vector.multi_reduction <maximumf>, %28, %cst_7 [1] : vector<4x256xf32> to vector<4xf32>
    %30 = vector.shape_cast %29 : vector<4xf32> to vector<4x1xf32>
    %31 = vector.broadcast %30 : vector<4x1xf32> to vector<4x256xf32>
    %32 = arith.subf %28, %31 : vector<4x256xf32>
    %33 = math.exp %32 : vector<4x256xf32>
    %cst_8 = arith.constant dense<0.000000e+00> : vector<4xf32>
    %34 = vector.multi_reduction <add>, %33, %cst_8 [1] : vector<4x256xf32> to vector<4xf32>
    %35 = vector.shape_cast %34 : vector<4xf32> to vector<4x1xf32>
    %36 = tpu.reciprocal %35 {approx = true} : vector<4x1xf32> -> vector<4x1xf32>
    %37 = vector.broadcast %36 : vector<4x1xf32> to vector<4x256xf32>
    %38 = arith.mulf %33, %37 : vector<4x256xf32>
    %39 = arith.truncf %38 : vector<4x256xf32> to vector<4x256xbf16>
    %40 = vector.extract_strided_slice %3 {offsets = [0, 768], sizes = [4, 256], strides = [1, 1]} : vector<4x1024xf32> to vector<4x256xf32>
    %cst_9 = arith.constant dense<0xFF800000> : vector<4xf32>
    %41 = vector.multi_reduction <maximumf>, %40, %cst_9 [1] : vector<4x256xf32> to vector<4xf32>
    %42 = vector.shape_cast %41 : vector<4xf32> to vector<4x1xf32>
    %43 = vector.broadcast %42 : vector<4x1xf32> to vector<4x256xf32>
    %44 = arith.subf %40, %43 : vector<4x256xf32>
    %45 = math.exp %44 : vector<4x256xf32>
    %cst_10 = arith.constant dense<0.000000e+00> : vector<4xf32>
    %46 = vector.multi_reduction <add>, %45, %cst_10 [1] : vector<4x256xf32> to vector<4xf32>
    %47 = vector.shape_cast %46 : vector<4xf32> to vector<4x1xf32>
    %48 = tpu.reciprocal %47 {approx = true} : vector<4x1xf32> -> vector<4x1xf32>
    %49 = vector.broadcast %48 : vector<4x1xf32> to vector<4x256xf32>
    %50 = arith.mulf %45, %49 : vector<4x256xf32>
    %51 = arith.truncf %50 : vector<4x256xf32> to vector<4x256xbf16>
    %52 = tpu.concatenate %15, %27, %39, %51 in 1 : vector<4x256xbf16>, vector<4x256xbf16>, vector<4x256xbf16>, vector<4x256xbf16> -> vector<4x1024xbf16>
    %c0_11 = arith.constant 0 : index
    %c0_12 = arith.constant 0 : index
    %53 = vector.load %arg3[%c0_11, %c0_12] : memref<1024x128xbf16, #tpu.memory_space<vmem>>, vector<1024x128xbf16>
    %cst_13 = arith.constant dense<0.000000e+00> : vector<4x128xf32>
    %54 = tpu.matmul %52, %53, %cst_13 {dimension_numbers = #tpu.dot_dimension_numbers<[1], [0], [0], [1], [0, 0, 1, 1], [], []>} : vector<4x1024xbf16>, vector<1024x128xbf16>, vector<4x128xf32> -> vector<4x128xf32>
    %c0_14 = arith.constant 0 : index
    %c0_15 = arith.constant 0 : index
    %55 = vector.load %arg4[%c0_14, %c0_15] : memref<4x128xf32, #tpu.memory_space<vmem>>, vector<4x128xf32>
    tpu.vector_store %arg4[%c0_14, %c0_15], %54 {strides = array<i32>} : memref<4x128xf32, #tpu.memory_space<vmem>>, vector<4x128xf32>,
    return
  }
  func.func @transform_0(%arg0: i32) -> (i32, i32) {
    %c0_i32 = arith.constant 0 : i32
    %c0_i32_0 = arith.constant 0 : i32
    return %arg0, %c0_i32 : i32, i32
  }
  func.func @transform_1(%arg0: i32) -> (i32, i32) {
    %c0_i32 = arith.constant 0 : i32
    %c0_i32_0 = arith.constant 0 : i32
    %c0_i32_1 = arith.constant 0 : i32
    return %c0_i32, %c0_i32_0 : i32, i32
  }
  func.func @transform_2(%arg0: i32) -> (i32, i32) {
    %c0_i32 = arith.constant 0 : i32
    %c0_i32_0 = arith.constant 0 : i32
    %c0_i32_1 = arith.constant 0 : i32
    return %c0_i32, %c0_i32_0 : i32, i32
  }
  func.func @transform_3(%arg0: i32) -> (i32, i32) {
    %c0_i32 = arith.constant 0 : i32
    %c0_i32_0 = arith.constant 0 : i32
    return %arg0, %c0_i32 : i32, i32
  }
}

</mosaic_0001>

<bundles_post_ra>
// kernel: tpu_custom_call.1
= control target key start
LH: loop header
LB: loop body
LE: loop exit
PB: predicated region body
PF: predicated region fallthrough
CT: control target
= control target key end

     0   :  { %8 = vsyncpa [#allocation3], 0  ;;  %s1953_s0 = inlined_call_operand.hbm [shape: f32[4,128], index: 0, kind: input, shape index: {}]   ;;  %s1954_s1 = inlined_call_operand.hbm [shape: bf16[128,1024], index: 1, kind: input, shape index: {}]   ;;  %s1955_s2 = inlined_call_operand.hbm [shape: bf16[1024,128], index: 2, kind: input, shape index: {}]   ;;  %s1956_s3 = inlined_call_operand.hbm [shape: f32[4,128], index: 3, kind: output, shape index: {}]  }
   0x1   :  { %9 = vsyncpa [#allocation6], 0 }
   0x2   :  { %10 = vsyncpa [#allocation4], 0  ;;  %s1786_s12 = smov [#allocation5]   ;;  %s1692_s16 = scalar_lea.hbm %s1954_s1, 8192 }
   0x3   :  { %s26_s13 = sshll.u32 %s1786_s12, 4  ;;  %p1693_p0 = scmp.ne.s32.totalorder %s1954_s1, %s1692_s16  ;;  %s27_s13 = int_to_ptr.vmem [resolvable:$true] %s26_s13 }
   0x4   :  { %p1696_p1 = scmp.lt.u32.totalorder %s1692_s16, %s1954_s1 }
   0x6   :  { %p1698_p2 = pnand %p1696_p1, %p1693_p0 }
   0x8   :  { %1701 = shalt.err (!%p1698_p2)
}
   0x9   :  { %s1702_s21 = scalar_lea.vmem %s27_s13, 8192  ;;  %p1707_p4 = scmp.lt.s32.totalorder %s27_s13, %s27_s13 }
   0xa   :  { %p1703_p3 = scmp.ne.s32.totalorder %s27_s13, %s1702_s21  ;;  %p1708_p5 = scmp.lt.s32.totalorder %s1702_s21, %s1702_s21 }
   0xc   :  { %p1709_p6 = por %p1708_p5, %p1707_p4 }
   0xe   :  { %p1710_p7 = pnand %p1709_p6, %p1703_p3 }
  0x10   :  { %1713 = shalt.err (!%p1710_p7)
}
  0x11   :  { %s1787_s22 = smov 512   ;;  %s1788_s23 = smov 32  }
  0x12   :  { %32 = dma.hbm_to_vmem [thread:$0]  %s1954_s1, 8192, %s27_s13, [#allocation6], %s1787_s22, %s1787_s22, %s1788_s23  }
  0x13   :  { %s1789_s26 = smov [#allocation2]   ;;  %s1790_s28 = smov [#allocation7]  }
  0x14   :  { %s17_s27 = sshll.u32 %s1789_s26, 4  ;;  %s38_s29 = sshll.u32 %s1790_s28, 4  ;;  %s18_s27 = int_to_ptr.vmem [resolvable:$true] %s17_s27  ;;  %s39_s29 = int_to_ptr.vmem [resolvable:$true] %s38_s29 }
  0x15   :  { %s1714_s5 = scalar_lea.hbm %s1953_s0, 64 }
  0x16   :  { %p1715_p8 = scmp.ne.s32.totalorder %s1953_s0, %s1714_s5  ;;  %p1718_p9 = scmp.lt.u32.totalorder %s1714_s5, %s1953_s0 }
  0x18   :  { %p1720_p10 = pnand %p1718_p9, %p1715_p8 }
  0x1a   :  { %1723 = shalt.err (!%p1720_p10)
}
  0x1b   :  { %s1724_s1 = scalar_lea.vmem %s18_s27, 64  ;;  %p1729_p12 = scmp.lt.s32.totalorder %s18_s27, %s18_s27 }
  0x1c   :  { %p1725_p11 = scmp.ne.s32.totalorder %s18_s27, %s1724_s1  ;;  %p1730_p13 = scmp.lt.s32.totalorder %s1724_s1, %s1724_s1 }
  0x1e   :  { %p1731_p0 = por %p1730_p13, %p1729_p12 }
  0x20   :  { %p1732_p1 = pnand %p1731_p0, %p1725_p11 }
  0x22   :  { %1735 = shalt.err (!%p1732_p1)
}
  0x23   :  { %20 = dma.hbm_to_vmem [thread:$0]  %s1953_s0, 64, %s18_s27, [#allocation3]  }
  0x24   :  { %s1736_s14 = scalar_lea.hbm %s1955_s2, 8192 }
  0x25   :  { %p1737_p2 = scmp.ne.s32.totalorder %s1955_s2, %s1736_s14  ;;  %p1740_p3 = scmp.lt.u32.totalorder %s1736_s14, %s1955_s2 }
  0x27   :  { %p1742_p4 = pnand %p1740_p3, %p1737_p2 }
  0x29   :  { %1745 = shalt.err (!%p1742_p4)
}
  0x2a   :  { %s1746_s19 = scalar_lea.vmem %s39_s29, 8192  ;;  %p1751_p6 = scmp.lt.s32.totalorder %s39_s29, %s39_s29 }
  0x2b   :  { %p1747_p5 = scmp.ne.s32.totalorder %s39_s29, %s1746_s19  ;;  %p1752_p7 = scmp.lt.s32.totalorder %s1746_s19, %s1746_s19 }
  0x2d   :  { %p1753_p8 = por %p1752_p7, %p1751_p6 }
  0x2f   :  { %p1754_p9 = pnand %p1753_p8, %p1747_p5 }
  0x31   :  { %1757 = shalt.err (!%p1754_p9)
}
  0x32   :  { %s1791_s0 = smov 64   ;;  %s1792_s20 = smov 4  }
  0x33   :  { %44 = dma.hbm_to_vmem [thread:$0]  %s1955_s2, 8192, %s39_s29, [#allocation6], %s1791_s0, %s1791_s0, %s1792_s20  }
  0x34   :  { %1780 = dma.done.wait [#allocation3], 64  }
  0x35   :  { %1781 = vsyncadd [#allocation3], 4294967232 }
  0x36   :  { %1782 = dma.done.wait [#allocation6], 16384  }
  0x37   :  { %1783 = vsyncadd [#allocation6], 4294950912  ;;  %v1793_v0 = vmov 0   ;;  %v57_v1 = vld [vmem:[#allocation5] sm:$0xff]  ;;  %v58_v3 = vld [vmem:[#allocation5 + $0x8] sm:$0xff]  ;;  %vm605_vm0 = vcmask 1043456  }
  0x38   :  { %473 = vmatprep.mubr.bf16.mxu0 %v1793_v0  ;;  %514 = vmatprep.mubr.bf16.mxu1 %v1793_v0  ;;  %v61_v2 = vld [vmem:[#allocation5 + $0x20] sm:$0xff]  ;;  %v62_v6 = vld [vmem:[#allocation5 + $0x28] sm:$0xff]  ;;  %v59_v60 = vld [vmem:[#allocation5 + $0x10] sm:$0xff]  ;;  %s1794_s2 = smov [#allocation8]  }
  0x39   :  { %v1380_v4 = vcombine.high %v57_v1, %v61_v2  ;;  %v1379_v5 = vcombine.low %v57_v1, %v61_v2  ;;  %v65_v7 = vld [vmem:[#allocation5 + $0x40] sm:$0xff]  ;;  %v1382_v9 = vcombine.high %v58_v3, %v62_v6  ;;  %v1381_v10 = vcombine.low %v58_v3, %v62_v6  ;;  %v66_v12 = vld [vmem:[#allocation5 + $0x48] sm:$0xff]  ;;  %v63_v61 = vld [vmem:[#allocation5 + $0x30] sm:$0xff]  ;;  %s1369_s23 = sshll.u32 %s1794_s2, 4  ;;  %s1370_s23 = int_to_ptr.vmem [resolvable:$true] %s1369_s23 }
  0x3a   :  { %v69_v8 = vld [vmem:[#allocation5 + $0x60] sm:$0xff]  ;;  %v70_v13 = vld [vmem:[#allocation5 + $0x68] sm:$0xff]  ;;  %v60_v1 = vld [vmem:[#allocation5 + $0x18] sm:$0xff]  ;;  %s1758_s24 = scalar_lea.vmem %s1370_s23, 64  ;;  %p1763_p11 = scmp.lt.s32.totalorder %s1370_s23, %s1370_s23 }
  0x3b   :  { %v1388_v11 = vcombine.high %v65_v7, %v69_v8  ;;  %v73_v14 = vld [vmem:[#allocation5 + $0x80] sm:$0xff]  ;;  %441 = vmatprep.subr.bf16.mxu0 %v1380_v4  ;;  %v1390_v15 = vcombine.high %v66_v12, %v70_v13  ;;  %v74_v17 = vld [vmem:[#allocation5 + $0x88] sm:$0xff]  ;;  %482 = vmatprep.subr.bf16.mxu1 %v1382_v9  ;;  %v1387_v19 = vcombine.low %v65_v7, %v69_v8  ;;  %v64_v2 = vld [vmem:[#allocation5 + $0x38] sm:$0xff]  ;;  %p1759_p10 = scmp.ne.s32.totalorder %s1370_s23, %s1758_s24  ;;  %p1764_p12 = scmp.lt.s32.totalorder %s1758_s24, %s1758_s24 }
  0x3c   :  { %v77_v16 = vld [vmem:[#allocation5 + $0xa0] sm:$0xff]  ;;  %v78_v18 = vld [vmem:[#allocation5 + $0xa8] sm:$0xff]  ;;  %442 = vmatpush1.bf16.msra.mxu0 %v1379_v5  ;;  %483 = vmatpush1.bf16.msra.mxu1 %v1381_v10  ;;  %v1389_v20 = vcombine.low %v66_v12, %v70_v13  ;;  %v55_v4 = vld [vmem:[#allocation2] sm:$0xf]  ;;  %v1384_v9 = vcombine.high %v59_v60, %v63_v61  ;;  %v1386_v12 = vcombine.high %v60_v1, %v64_v2 }
  0x3d   :  { %443 = vmatprep.subr.bf16.mxu0 %v1388_v11  ;;  %v1396_v21 = vcombine.high %v73_v14, %v77_v16  ;;  %484 = vmatprep.subr.bf16.mxu1 %v1390_v15  ;;  %v1398_v22 = vcombine.high %v74_v17, %v78_v18  ;;  %v81_v23 = vld [vmem:[#allocation5 + $0xc0] sm:$0xff]  ;;  %v82_v25 = vld [vmem:[#allocation5 + $0xc8] sm:$0xff]  ;;  %v1395_v27 = vcombine.low %v73_v14, %v77_v16  ;;  %v67_v6 = vld [vmem:[#allocation5 + $0x50] sm:$0xff]  ;;  %p1765_p13 = por %p1764_p12, %p1763_p11 }
  0x3e   :  { %v85_v24 = vld [vmem:[#allocation5 + $0xe0] sm:$0xff]  ;;  %v86_v26 = vld [vmem:[#allocation5 + $0xe8] sm:$0xff]  ;;  %v1397_v28 = vcombine.low %v74_v17, %v78_v18  ;;  %v71_v7 = vld [vmem:[#allocation5 + $0x70] sm:$0xff]  ;;  %v1853_v13 = vpack.c.bf16 %v55_v4, %v55_v4  ;;  %v1383_v14 = vcombine.low %v59_v60, %v63_v61  ;;  %v1385_v17 = vcombine.low %v60_v1, %v64_v2 }
  0x3f   :  { %v1404_v29 = vcombine.high %v81_v23, %v85_v24  ;;  %v1406_v30 = vcombine.high %v82_v25, %v86_v26  ;;  %v89_v31 = vld [vmem:[#allocation5 + $0x100] sm:$0xff]  ;;  %v90_v33 = vld [vmem:[#allocation5 + $0x108] sm:$0xff]  ;;  %v1403_v35 = vcombine.low %v81_v23, %v85_v24  ;;  %v1405_v36 = vcombine.low %v82_v25, %v86_v26  ;;  %v68_v10 = vld [vmem:[#allocation5 + $0x58] sm:$0xff]  ;;  %p1766_p0 = pnand %p1765_p13, %p1759_p10 }
  0x40   :  { %444 = vmatpush1.bf16.msra.mxu0 %v1387_v19  ;;  %485 = vmatpush1.bf16.msra.mxu1 %v1389_v20  ;;  %v93_v32 = vld [vmem:[#allocation5 + $0x120] sm:$0xff]  ;;  %v94_v34 = vld [vmem:[#allocation5 + $0x128] sm:$0xff]  ;;  %v72_v11 = vld [vmem:[#allocation5 + $0x78] sm:$0xff]  ;;  %v1392_v18 = vcombine.high %v67_v6, %v71_v7 }
  0x41   :  { %445 = vmatprep.subr.bf16.mxu0 %v1396_v21  ;;  %486 = vmatprep.subr.bf16.mxu1 %v1398_v22  ;;  %v1412_v37 = vcombine.high %v89_v31, %v93_v32  ;;  %v1414_v38 = vcombine.high %v90_v33, %v94_v34  ;;  %v97_v39 = vld [vmem:[#allocation5 + $0x140] sm:$0xff]  ;;  %v98_v41 = vld [vmem:[#allocation5 + $0x148] sm:$0xff]  ;;  %v1411_v43 = vcombine.low %v89_v31, %v93_v32  ;;  %v75_v15 = vld [vmem:[#allocation5 + $0x90] sm:$0xff] }
  0x42   :  { %v101_v40 = vld [vmem:[#allocation5 + $0x160] sm:$0xff]  ;;  %v102_v42 = vld [vmem:[#allocation5 + $0x168] sm:$0xff]  ;;  %v1413_v44 = vcombine.low %v90_v33, %v94_v34  ;;  %v79_v16 = vld [vmem:[#allocation5 + $0xb0] sm:$0xff]  ;;  %v1394_v21 = vcombine.high %v68_v10, %v72_v11  ;;  %v1391_v22 = vcombine.low %v67_v6, %v71_v7  ;;  %v1393_v25 = vcombine.low %v68_v10, %v72_v11 }
  0x43   :  { %v1420_v45 = vcombine.high %v97_v39, %v101_v40  ;;  %v1422_v46 = vcombine.high %v98_v41, %v102_v42  ;;  %v105_v47 = vld [vmem:[#allocation5 + $0x180] sm:$0xff]  ;;  %v106_v49 = vld [vmem:[#allocation5 + $0x188] sm:$0xff]  ;;  %v1419_v51 = vcombine.low %v97_v39, %v101_v40  ;;  %v1421_v54 = vcombine.low %v98_v41, %v102_v42  ;;  %v76_v19 = vld [vmem:[#allocation5 + $0x98] sm:$0xff] }
  0x44   :  { %446 = vmatpush1.bf16.msra.mxu0 %v1395_v27  ;;  %487 = vmatpush1.bf16.msra.mxu1 %v1397_v28  ;;  %v109_v48 = vld [vmem:[#allocation5 + $0x1a0] sm:$0xff]  ;;  %v110_v50 = vld [vmem:[#allocation5 + $0x1a8] sm:$0xff]  ;;  %v80_v20 = vld [vmem:[#allocation5 + $0xb8] sm:$0xff]  ;;  %v1400_v26 = vcombine.high %v75_v15, %v79_v16 }
  0x45   :  { %447 = vmatprep.subr.bf16.mxu0 %v1404_v29  ;;  %488 = vmatprep.subr.bf16.mxu1 %v1406_v30  ;;  %v113_v52 = vld [vmem:[#allocation5 + $0x1c0] sm:$0xff]  ;;  %v1428_v55 = vcombine.high %v105_v47, %v109_v48  ;;  %v114_v56 = vld [vmem:[#allocation5 + $0x1c8] sm:$0xff]  ;;  %v1430_v58 = vcombine.high %v106_v49, %v110_v50  ;;  %v1427_v59 = vcombine.low %v105_v47, %v109_v48  ;;  %v83_v23 = vld [vmem:[#allocation5 + $0xd0] sm:$0xff] }
  0x46   :  { %v117_v53 = vld [vmem:[#allocation5 + $0x1e0] sm:$0xff]  ;;  %v118_v57 = vld [vmem:[#allocation5 + $0x1e8] sm:$0xff]  ;;  %v1429_v62 = vcombine.low %v106_v49, %v110_v50  ;;  %v87_v24 = vld [vmem:[#allocation5 + $0xf0] sm:$0xff]  ;;  %v1402_v29 = vcombine.high %v76_v19, %v80_v20  ;;  %v1399_v30 = vcombine.low %v75_v15, %v79_v16  ;;  %v1401_v33 = vcombine.low %v76_v19, %v80_v20 }
  0x47   :  { %v1436_v63 = vcombine.high %v113_v52, %v117_v53  ;;  %v1438_v3 = vcombine.high %v114_v56, %v118_v57  ;;  %v1435_v5 = vcombine.low %v113_v52, %v117_v53  ;;  %v1437_v8 = vcombine.low %v114_v56, %v118_v57  ;;  %v84_v27 = vld [vmem:[#allocation5 + $0xd8] sm:$0xff]  ;;  %v91_v31 = vld [vmem:[#allocation5 + $0x110] sm:$0xff] }
  0x48   :  { %448 = vmatpush1.bf16.msra.mxu0 %v1403_v35  ;;  %489 = vmatpush1.bf16.msra.mxu1 %v1405_v36  ;;  %v88_v28 = vld [vmem:[#allocation5 + $0xf8] sm:$0xff]  ;;  %v95_v32 = vld [vmem:[#allocation5 + $0x130] sm:$0xff]  ;;  %v1408_v34 = vcombine.high %v83_v23, %v87_v24 }
  0x49   :  { %449 = vmatprep.subr.bf16.mxu0 %v1412_v37  ;;  %490 = vmatprep.subr.bf16.mxu1 %v1414_v38  ;;  %v92_v35 = vld [vmem:[#allocation5 + $0x118] sm:$0xff]  ;;  %v1410_v37 = vcombine.high %v84_v27, %v88_v28  ;;  %v1407_v38 = vcombine.low %v83_v23, %v87_v24  ;;  %v99_v39 = vld [vmem:[#allocation5 + $0x150] sm:$0xff]  ;;  %v1409_v41 = vcombine.low %v84_v27, %v88_v28 }
  0x4a   :  { %v96_v36 = vld [vmem:[#allocation5 + $0x138] sm:$0xff]  ;;  %v103_v40 = vld [vmem:[#allocation5 + $0x170] sm:$0xff] }
  0x4b   :  { %v100_v42 = vld [vmem:[#allocation5 + $0x158] sm:$0xff]  ;;  %v111_v47 = vld [vmem:[#allocation5 + $0x1b0] sm:$0xff]  ;;  %v1417_v48 = vcombine.low %v92_v35, %v96_v36  ;;  %v1424_v49 = vcombine.high %v99_v39, %v103_v40  ;;  %v1423_v53 = vcombine.low %v99_v39, %v103_v40  ;;  %v1613_v40 = vld [vmem:[#allocation7 + $0x88] sm:$0xff]  }
  0x4c   :  { %450 = vmatpush1.bf16.msra.mxu0 %v1411_v43  ;;  %491 = vmatpush1.bf16.msra.mxu1 %v1413_v44  ;;  %v104_v43 = vld [vmem:[#allocation5 + $0x178] sm:$0xff]  ;;  %v1418_v44 = vcombine.high %v92_v35, %v96_v36  ;;  %v1607_v35 = vld [vmem:[#allocation7 + $0xc0] sm:$0xff]   ;;  %v1610_v39 = vld [vmem:[#allocation7 + $0x50] sm:$0xff]  }
  0x4d   :  { %451 = vmatprep.subr.bf16.mxu0 %v1420_v45  ;;  %492 = vmatprep.subr.bf16.mxu1 %v1422_v46  ;;  %v1415_v45 = vcombine.low %v91_v31, %v95_v32  ;;  %v107_v46 = vld [vmem:[#allocation5 + $0x190] sm:$0xff]  ;;  %v108_v50 = vld [vmem:[#allocation5 + $0x198] sm:$0xff]  ;;  %v1426_v52 = vcombine.high %v100_v42, %v104_v43  ;;  %v1425_v56 = vcombine.low %v100_v42, %v104_v43  ;;  %v1609_v36 = vld [vmem:[#allocation7 + $0x80] sm:$0xff]  }
  0x4e   :  { %v1432_v57 = vcombine.high %v107_v46, %v111_v47  ;;  %v1431_v61 = vcombine.low %v107_v46, %v111_v47  ;;  %v1614_v42 = vld [vmem:[#allocation7 + $0x58] sm:$0xff]   ;;  %v1617_v43 = vld [vmem:[#allocation7 + $0x90] sm:$0xff]  }
  0x50   :  { %452 = vmatpush1.bf16.msra.mxu0 %v1419_v51  ;;  %493 = vmatpush1.bf16.msra.mxu1 %v1421_v54  ;;  %v112_v51 = vld [vmem:[#allocation5 + $0x1b8] sm:$0xff]  ;;  %v115_v54 = vld [vmem:[#allocation5 + $0x1d0] sm:$0xff] }
  0x51   :  { %453 = vmatprep.subr.bf16.mxu0 %v1428_v55  ;;  %494 = vmatprep.subr.bf16.mxu1 %v1430_v58  ;;  %v119_v55 = vld [vmem:[#allocation5 + $0x1f0] sm:$0xff]  ;;  %v116_v58 = vld [vmem:[#allocation5 + $0x1d8] sm:$0xff]  ;;  %v1434_v60 = vcombine.high %v108_v50, %v112_v51 }
  0x52   :  { %v1439_v2 = vcombine.low %v115_v54, %v119_v55 }
  0x54   :  { %454 = vmatpush1.bf16.msra.mxu0 %v1427_v59  ;;  %495 = vmatpush1.bf16.msra.mxu1 %v1429_v62  ;;  %v120_v59 = vld [vmem:[#allocation5 + $0x1f8] sm:$0xff]  ;;  %v1433_v62 = vcombine.low %v108_v50, %v112_v51 }
  0x55   :  { %455 = vmatprep.subr.bf16.mxu0 %v1436_v63  ;;  %496 = vmatprep.subr.bf16.mxu1 %v1438_v3  ;;  %v1440_v63 = vcombine.high %v115_v54, %v119_v55  ;;  %v1442_v1 = vcombine.high %v116_v58, %v120_v59  ;;  %v1441_v3 = vcombine.low %v116_v58, %v120_v59 }
  0x58   :  { %456 = vmatpush1.bf16.msra.mxu0 %v1435_v5  ;;  %497 = vmatpush1.bf16.msra.mxu1 %v1437_v8 }
  0x59   :  { %523 = vmatprep.subr.bf16.mxu0 %v1384_v9  ;;  %564 = vmatprep.subr.bf16.mxu1 %v1386_v12 }
  0x5b   :  { %474 = vmatmul.mubr.bf16.vlgmr.msra.gmra.mrb[0].mxu0 %v1853_v13  ;;  %515 = vmatmul.mubr.bf16.vlgmr.msra.gmra.mrb[0].mxu1 %v1853_v13 }
  0x5c   :  { %524 = vmatpush1.bf16.msra.mxu0 %v1383_v14  ;;  %565 = vmatpush1.bf16.msra.mxu1 %v1385_v17 }
  0x5d   :  { %525 = vmatprep.subr.bf16.mxu0 %v1392_v18  ;;  %566 = vmatprep.subr.bf16.mxu1 %v1394_v21 }
  0x5e   :  { %555 = vmatprep.mubr.bf16.mxu0 %v1793_v0  ;;  %596 = vmatprep.mubr.bf16.mxu1 %v1793_v0  ;;  %v1416_v0 = vcombine.high %v91_v31, %v95_v32  ;;  %v1604_v32 = vld [vmem:[#allocation7 + $0x40] sm:$0xff]  }
  0x60   :  { %526 = vmatpush1.bf16.msra.mxu0 %v1391_v22  ;;  %567 = vmatpush1.bf16.msra.mxu1 %v1393_v25 }
  0x61   :  { %527 = vmatprep.subr.bf16.mxu0 %v1400_v26  ;;  %568 = vmatprep.subr.bf16.mxu1 %v1402_v29 }
  0x64   :  { %528 = vmatpush1.bf16.msra.mxu0 %v1399_v30  ;;  %569 = vmatpush1.bf16.msra.mxu1 %v1401_v33  ;;  %v1605_v33 = vld [vmem:[#allocation7] sm:$0xff]  }
  0x65   :  { %529 = vmatprep.subr.bf16.mxu0 %v1408_v34  ;;  %570 = vmatprep.subr.bf16.mxu1 %v1410_v37  ;;  %v1606_v34 = vld [vmem:[#allocation7 + $0x48] sm:$0xff]  }
  0x66   :  { %v1611_v37 = vld [vmem:[#allocation7 + $0xc8] sm:$0xff]  }
  0x68   :  { %530 = vmatpush1.bf16.msra.mxu0 %v1407_v38  ;;  %571 = vmatpush1.bf16.msra.mxu1 %v1409_v41  ;;  %v1608_v38 = vld [vmem:[#allocation7 + $0x8] sm:$0xff]   ;;  %v1615_v41 = vld [vmem:[#allocation7 + $0xd0] sm:$0xff]  }
  0x69   :  { %531 = vmatprep.subr.bf16.mxu0 %v1416_v0  ;;  %572 = vmatprep.subr.bf16.mxu1 %v1418_v44  ;;  %v1612_v0 = vld [vmem:[#allocation7 + $0x10] sm:$0xff]   ;;  %v1616_v44 = vld [vmem:[#allocation7 + $0x18] sm:$0xff]  }
  0x6c   :  { %532 = vmatpush1.bf16.msra.mxu0 %v1415_v45  ;;  %573 = vmatpush1.bf16.msra.mxu1 %v1417_v48 }
  0x6d   :  { %533 = vmatprep.subr.bf16.mxu0 %v1424_v49  ;;  %574 = vmatprep.subr.bf16.mxu1 %v1426_v52 }
  0x70   :  { %534 = vmatpush1.bf16.msra.mxu0 %v1423_v53  ;;  %575 = vmatpush1.bf16.msra.mxu1 %v1425_v56 }
  0x71   :  { %535 = vmatprep.subr.bf16.mxu0 %v1432_v57  ;;  %576 = vmatprep.subr.bf16.mxu1 %v1434_v60 }
  0x74   :  { %536 = vmatpush1.bf16.msra.mxu0 %v1431_v61  ;;  %577 = vmatpush1.bf16.msra.mxu1 %v1433_v62 }
  0x75   :  { %537 = vmatprep.subr.bf16.mxu0 %v1440_v63  ;;  %578 = vmatprep.subr.bf16.mxu1 %v1442_v1 }
  0x78   :  { %538 = vmatpush1.bf16.msra.mxu0 %v1439_v2  ;;  %579 = vmatpush1.bf16.msra.mxu1 %v1441_v3  ;;  %v1618_v3 = vld [vmem:[#allocation7 + $0x60] sm:$0xff]  }
  0x79   :  { %1507 = vmatprep.subr.bf16.mxu0 %v1604_v32  ;;  %1529 = vmatprep.subr.bf16.mxu1 %v1607_v35  ;;  %v1635_v32 = vld [vmem:[#allocation7 + $0x140] sm:$0xff]  }
  0x7b   :  { %556 = vmatmul.mubr.bf16.vlgmr.msra.gmra.mrb[4].mxu0 %v1853_v13  ;;  %597 = vmatmul.mubr.bf16.vlgmr.msra.gmra.mrb[4].mxu1 %v1853_v13 }
  0x7c   :  { %1508 = vmatpush3.bf16.msra.mxu0 %v1605_v33  ;;  %1530 = vmatpush3.bf16.msra.mxu1 %v1609_v36 }
  0x7d   :  { %1509 = vmatprep.subr.bf16.mxu0 %v1606_v34  ;;  %1531 = vmatprep.subr.bf16.mxu1 %v1611_v37  ;;  %v1636_v34 = vld [vmem:[#allocation7 + $0xb8] sm:$0xff]  }
  0x80   :  { %1510 = vmatpush3.bf16.msra.mxu0 %v1608_v38  ;;  %1532 = vmatpush3.bf16.msra.mxu1 %v1613_v40 }
  0x81   :  { %1511 = vmatprep.subr.bf16.mxu0 %v1610_v39  ;;  %1533 = vmatprep.subr.bf16.mxu1 %v1615_v41  ;;  %v1639_v39 = vld [vmem:[#allocation7 + $0x1c0] sm:$0xff]  }
  0x84   :  { %1512 = vmatpush3.bf16.msra.mxu0 %v1612_v0  ;;  %1534 = vmatpush3.bf16.msra.mxu1 %v1617_v43 }
  0x85   :  { %1513 = vmatprep.subr.bf16.mxu0 %v1614_v42 }
  0x88   :  { %1514 = vmatpush3.bf16.msra.mxu0 %v1616_v44 }
  0x89   :  { %1515 = vmatprep.subr.bf16.mxu0 %v1618_v3  ;;  %v1651_v3 = vld [vmem:[#allocation7 + $0x1d8] sm:$0xff]  }
 0x12e   :  { %v1861_v4 = vpop.f32.mrb[0].mxu0  ;;  %v1865_v6 = vpop.f32.mrb[0].mxu1 }
 0x12f   :  { %v1863_v5 = vpop.f32.mrb[1].mxu0  ;;  %v606_v7 = vsel %vm605_vm0, %v1861_v4, -inf  ;;  %v627_v9 = vsel %vm605_vm0, %v1865_v6, -inf  ;;  %v1871_v10 = vpop.f32.mrb[1].mxu1 }
 0x130   :  { %v479_v8 = vpop.f32.mrb[2].mxu0  ;;  %v607_v11 = vsel %vm605_vm0, %v1863_v5, -inf  ;;  %v628_v13 = vsel %vm605_vm0, %v1871_v10, -inf  ;;  %v520_v14 = vpop.f32.mrb[2].mxu1 }
 0x131   :  { %v480_v12 = vpop.f32.mrb[3].mxu0  ;;  %v608_v15 = vmax.f32 %v606_v7, %v607_v11  ;;  %v521_v16 = vpop.f32.mrb[3].mxu1  ;;  %v629_v17 = vmax.f32 %v627_v9, %v628_v13  ;;  %v1620_v7 = vld [vmem:[#allocation7 + $0x20] sm:$0xff]   ;;  %v1621_v8 = vld [vmem:[#allocation7 + $0x98] sm:$0xff]  }
 0x132   :  { %1516 = vmatpush3.bf16.msra.mxu0 %v1620_v7  ;;  %v1622_v12 = vld [vmem:[#allocation7 + $0x68] sm:$0xff]   ;;  %v1623_v13 = vld [vmem:[#allocation7 + $0xe0] sm:$0xff]  }
 0x133   :  { %609 = vmax.xlane.f32.xlu0 %v608_v15  ;;  %v1624_v16 = vld [vmem:[#allocation7 + $0x28] sm:$0xff]   ;;  %1517 = vmatprep.subr.bf16.mxu0 %v1622_v12  ;;  %v1655_v7 = vld [vmem:[#allocation7 + $0x1e0] sm:$0xff]  }
 0x134   :  { %v1659_v12 = vld [vmem:[#allocation7 + $0x1e8] sm:$0xff]  }
 0x136   :  { %1518 = vmatpush3.bf16.msra.mxu0 %v1624_v16  ;;  %v1662_v16 = vld [vmem:[#allocation7 + $0x178] sm:$0xff]  }
 0x137   :  { %630 = vmax.xlane.f32.xlu0 %v629_v17  ;;  %v1625_v17 = vld [vmem:[#allocation7 + $0xa0] sm:$0xff]  }
 0x14e   :  { %v1877_v18 = vpop.f32.mrb[4].mxu0  ;;  %v1881_v20 = vpop.f32.mrb[4].mxu1 }
 0x14f   :  { %v1879_v19 = vpop.f32.mrb[5].mxu0  ;;  %v648_v21 = vsel %vm605_vm0, %v1877_v18, -inf  ;;  %v669_v22 = vsel %vm605_vm0, %v1881_v20, -inf  ;;  %v1887_v24 = vpop.f32.mrb[5].mxu1 }
 0x150   :  { %v561_v23 = vpop.f32.mrb[6].mxu0  ;;  %v649_v25 = vsel %vm605_vm0, %v1879_v19, -inf  ;;  %v670_v26 = vsel %vm605_vm0, %v1887_v24, -inf  ;;  %v602_v28 = vpop.f32.mrb[6].mxu1 }
 0x151   :  { %v562_v27 = vpop.f32.mrb[7].mxu0  ;;  %v650_v29 = vmax.f32 %v648_v21, %v649_v25  ;;  %v603_v30 = vpop.f32.mrb[7].mxu1  ;;  %v671_v31 = vmax.f32 %v669_v22, %v670_v26  ;;  %v1628_v23 = vld [vmem:[#allocation7 + $0x30] sm:$0xff]   ;;  %v1629_v25 = vld [vmem:[#allocation7 + $0xa8] sm:$0xff]   ;;  %v1630_v26 = vld [vmem:[#allocation7 + $0x78] sm:$0xff]  }
 0x152   :  { %v1631_v27 = vld [vmem:[#allocation7 + $0xf0] sm:$0xff]  }
 0x153   :  { %651 = vmax.xlane.f32.xlu1 %v650_v29 }
 0x157   :  { %672 = vmax.xlane.f32.xlu1 %v671_v31  ;;  %v1634_v31 = vld [vmem:[#allocation7 + $0xf8] sm:$0xff]  }
 0x1c0   :  { %v610_v45 = vpop.xlane.xlu0 %609 }
 0x1c1   :  { %v611_v46 = vsub.f32 %v1861_v4, %v610_v45  ;;  %v612_v47 = vsub.f32 %v1863_v5, %v610_v45  ;;  %v1619_v4 = vld [vmem:[#allocation7 + $0xd8] sm:$0xff]  }
 0x1c2   :  { %1535 = vmatprep.subr.bf16.mxu1 %v1619_v4  ;;  %v1652_v4 = vld [vmem:[#allocation7 + $0x120] sm:$0xff]  }
 0x1c3   :  { %v613_v48 = vmul.f32 1.442695, %v611_v46  ;;  %v615_v49 = vmul.f32 1.442695, %v612_v47  ;;  %1536 = vmatpush3.bf16.msra.mxu1 %v1621_v8 }
 0x1c4   :  { %v631_v50 = vpop.xlane.xlu0 %630  ;;  %1537 = vmatprep.subr.bf16.mxu1 %v1623_v13 }
 0x1c5   :  { %1668 = vpow2.f32 %v613_v48  ;;  %v632_v51 = vsub.f32 %v1865_v6, %v631_v50  ;;  %v633_v52 = vsub.f32 %v1871_v10, %v631_v50  ;;  %v1637_v48 = vld [vmem:[#allocation7 + $0x100] sm:$0xff]   ;;  %v1638_v50 = vld [vmem:[#allocation7 + $0x148] sm:$0xff]  }
 0x1c6   :  { %1670 = vpow2.f32 %v615_v49 }
 0x1c7   :  { %v634_v53 = vmul.f32 1.442695, %v632_v51  ;;  %v636_v54 = vmul.f32 1.442695, %v633_v52  ;;  %1538 = vmatpush3.bf16.msra.mxu1 %v1625_v17  ;;  %v1663_v17 = vld [vmem:[#allocation7 + $0x1f0] sm:$0xff]  }
 0x1c9   :  { %1672 = vpow2.f32 %v634_v53 }
 0x1ca   :  { %1674 = vpow2.f32 %v636_v54 }
 0x1cf   :  { %v1897_v55 = vpop.eup %1668 }
 0x1d0   :  { %v1899_v56 = vpop.eup %1670  ;;  %v617_v57 = vsel %vm605_vm0, %v1897_v55, 0.0 }
 0x1d1   :  { %v618_v58 = vsel %vm605_vm0, %v1899_v56, 0.0 }
 0x1d2   :  { %v619_v59 = vadd.f32 %v618_v58, %v617_v57  ;;  %v1640_v57 = vld [vmem:[#allocation7 + $0x108] sm:$0xff]   ;;  %v1641_v58 = vld [vmem:[#allocation7 + $0x180] sm:$0xff]  }
 0x1d3   :  { %v1905_v60 = vpop.eup %1672 }
 0x1d4   :  { %v1907_v61 = vpop.eup %1674  ;;  %620 = vadd.xlane.f32.xlu0 %v619_v59  ;;  %v638_v62 = vsel %vm605_vm0, %v1905_v60, 0.0  ;;  %v1643_v59 = vld [vmem:[#allocation7 + $0x1c8] sm:$0xff]  }
 0x1d5   :  { %v639_v63 = vsel %vm605_vm0, %v1907_v61, 0.0 }
 0x1d6   :  { %v640_v1 = vadd.f32 %v639_v63, %v638_v62  ;;  %v1645_v62 = vld [vmem:[#allocation7 + $0x188] sm:$0xff]   ;;  %v1647_v63 = vld [vmem:[#allocation7 + $0x1d0] sm:$0xff]  }
 0x1d8   :  { %641 = vadd.xlane.f32.xlu1 %v640_v1  ;;  %v1649_v1 = vld [vmem:[#allocation7 + $0x190] sm:$0xff]  }
 0x1e0   :  { %v652_v2 = vpop.xlane.xlu1 %651 }
 0x1e1   :  { %v653_v5 = vsub.f32 %v1877_v18, %v652_v2  ;;  %v654_v6 = vsub.f32 %v1879_v19, %v652_v2  ;;  %v1626_v18 = vld [vmem:[#allocation7 + $0x70] sm:$0xff]   ;;  %v1627_v19 = vld [vmem:[#allocation7 + $0xe8] sm:$0xff]   ;;  %v1650_v2 = vld [vmem:[#allocation7 + $0x160] sm:$0xff]  }
 0x1e2   :  { %1519 = vmatprep.subr.bf16.mxu0 %v1626_v18  ;;  %1539 = vmatprep.subr.bf16.mxu1 %v1627_v19  ;;  %v1664_v18 = vld [vmem:[#allocation7 + $0x138] sm:$0xff]   ;;  %v1665_v19 = vld [vmem:[#allocation7 + $0x1b0] sm:$0xff]  }
 0x1e3   :  { %v655_v9 = vmul.f32 1.442695, %v653_v5  ;;  %v657_v10 = vmul.f32 1.442695, %v654_v6  ;;  %1520 = vmatpush3.bf16.msra.mxu0 %v1628_v23  ;;  %1540 = vmatpush3.bf16.msra.mxu1 %v1629_v25  ;;  %v1653_v5 = vld [vmem:[#allocation7 + $0x198] sm:$0xff]   ;;  %v1654_v6 = vld [vmem:[#allocation7 + $0x168] sm:$0xff]  }
 0x1e4   :  { %v673_v11 = vpop.xlane.xlu1 %672  ;;  %1521 = vmatprep.subr.bf16.mxu0 %v1630_v26  ;;  %1541 = vmatprep.subr.bf16.mxu1 %v1631_v27 }
 0x1e5   :  { %1676 = vpow2.f32 %v655_v9  ;;  %v674_v14 = vsub.f32 %v1881_v20, %v673_v11  ;;  %v675_v15 = vsub.f32 %v1887_v24, %v673_v11  ;;  %v1632_v20 = vld [vmem:[#allocation7 + $0x38] sm:$0xff]   ;;  %v1633_v24 = vld [vmem:[#allocation7 + $0xb0] sm:$0xff]   ;;  %v1656_v9 = vld [vmem:[#allocation7 + $0x128] sm:$0xff]  }
 0x1e6   :  { %1678 = vpow2.f32 %v657_v10  ;;  %v1657_v10 = vld [vmem:[#allocation7 + $0x1a0] sm:$0xff]   ;;  %v1658_v11 = vld [vmem:[#allocation7 + $0x170] sm:$0xff]  }
 0x1e7   :  { %v676_v21 = vmul.f32 1.442695, %v674_v14  ;;  %v678_v22 = vmul.f32 1.442695, %v675_v15  ;;  %1522 = vmatpush3.bf16.msra.mxu0 %v1632_v20  ;;  %1542 = vmatpush3.bf16.msra.mxu1 %v1633_v24  ;;  %v1660_v14 = vld [vmem:[#allocation7 + $0x130] sm:$0xff]   ;;  %v1661_v15 = vld [vmem:[#allocation7 + $0x1a8] sm:$0xff]  }
 0x1e8   :  { %1543 = vmatprep.subr.bf16.mxu1 %v1634_v31  ;;  %1551 = vmatprep.subr.bf16.mxu0 %v1635_v32  ;;  %v1667_v20 = vld [vmem:[#allocation7 + $0x1b8] sm:$0xff]  }
 0x1e9   :  { %1680 = vpow2.f32 %v676_v21 }
 0x1ea   :  { %1682 = vpow2.f32 %v678_v22  ;;  %v1666_v22 = vld [vmem:[#allocation7 + $0x1f8] sm:$0xff]  }
 0x1eb   :  { %1544 = vmatpush3.bf16.msra.mxu1 %v1636_v34 }
 0x1ec   :  { %1573 = vmatprep.subr.bf16.mxu1 %v1639_v39 }
 0x1ef   :  { %v1917_v28 = vpop.eup %1676 }
 0x1f0   :  { %v1919_v29 = vpop.eup %1678  ;;  %v659_v30 = vsel %vm605_vm0, %v1917_v28, 0.0 }
 0x1f1   :  { %v660_v33 = vsel %vm605_vm0, %v1919_v29, 0.0 }
 0x1f2   :  { %v661_v35 = vadd.f32 %v660_v33, %v659_v30 }
 0x1f3   :  { %v1925_v36 = vpop.eup %1680 }
 0x1f4   :  { %v1927_v37 = vpop.eup %1682  ;;  %662 = vadd.xlane.f32.xlu0 %v661_v35  ;;  %v680_v38 = vsel %vm605_vm0, %v1925_v36, 0.0 }
 0x1f5   :  { %v681_v40 = vsel %vm605_vm0, %v1927_v37, 0.0 }
 0x1f6   :  { %v682_v41 = vadd.f32 %v681_v40, %v680_v38 }
 0x1f8   :  { %683 = vadd.xlane.f32.xlu1 %v682_v41 }
 0x261   :  { %v621_v0 = vpop.xlane.xlu0 %620 }
 0x262   :  { %1684 = vrcp.f32 %v621_v0 }
 0x265   :  { %v642_v42 = vpop.xlane.xlu1 %641 }
 0x266   :  { %1686 = vrcp.f32 %v642_v42 }
 0x26c   :  { %v1685_v43 = vpop.eup %1684 }
 0x26d   :  { %v624_v44 = vmul.f32 %v1685_v43, %v1899_v56  ;;  %v623_v45 = vmul.f32 %v1685_v43, %v1897_v55  ;;  %v1642_v56 = vld [vmem:[#allocation7 + $0x150] sm:$0xff]  }
 0x26e   :  { %v1644_v55 = vld [vmem:[#allocation7 + $0x110] sm:$0xff]  }
 0x26f   :  { %v626_v46 = vpack.c.bf16 %v624_v44, %v624_v44  ;;  %v625_v47 = vpack.c.bf16 %v623_v45, %v623_v45 }
 0x270   :  { %v1687_v49 = vpop.eup %1686 }
 0x271   :  { %1234 = vmatprep.mubr.bf16.mxu0 %v626_v46  ;;  %v645_v51 = vmul.f32 %v1687_v49, %v1907_v61  ;;  %v644_v52 = vmul.f32 %v1687_v49, %v1905_v60  ;;  %v1646_v61 = vld [vmem:[#allocation7 + $0x158] sm:$0xff]  }
 0x272   :  { %1235 = vmatmul.mubr.bf16.vlgmr.msra.gmra.mrb[8].mxu0 %v625_v47  ;;  %v1648_v60 = vld [vmem:[#allocation7 + $0x118] sm:$0xff]  }
 0x273   :  { %1552 = vmatpush3.bf16.msra.mxu0 %v1637_v48  ;;  %v647_v53 = vpack.c.bf16 %v645_v51, %v645_v51  ;;  %v646_v54 = vpack.c.bf16 %v644_v52, %v644_v52 }
 0x274   :  { %1553 = vmatprep.subr.bf16.mxu0 %v1638_v50 }
 0x275   :  { %1274 = vmatprep.mubr.bf16.mxu1 %v647_v53 }
 0x276   :  { %1275 = vmatmul.mubr.bf16.vlgmr.msra.gmra.mrb[8].mxu1 %v646_v54 }
 0x277   :  { %1554 = vmatpush3.bf16.msra.mxu0 %v1640_v57  ;;  %1574 = vmatpush3.bf16.msra.mxu1 %v1641_v58 }
 0x278   :  { %1555 = vmatprep.subr.bf16.mxu0 %v1642_v56  ;;  %1575 = vmatprep.subr.bf16.mxu1 %v1643_v59 }
 0x27b   :  { %1556 = vmatpush3.bf16.msra.mxu0 %v1644_v55  ;;  %1576 = vmatpush3.bf16.msra.mxu1 %v1645_v62 }
 0x27c   :  { %1557 = vmatprep.subr.bf16.mxu0 %v1646_v61  ;;  %1577 = vmatprep.subr.bf16.mxu1 %v1647_v63 }
 0x27f   :  { %1558 = vmatpush3.bf16.msra.mxu0 %v1648_v60  ;;  %1578 = vmatpush3.bf16.msra.mxu1 %v1649_v1 }
 0x280   :  { %1559 = vmatprep.subr.bf16.mxu0 %v1650_v2  ;;  %1579 = vmatprep.subr.bf16.mxu1 %v1651_v3 }
 0x281   :  { %v663_v8 = vpop.xlane.xlu0 %662 }
 0x282   :  { %1688 = vrcp.f32 %v663_v8 }
 0x283   :  { %1560 = vmatpush3.bf16.msra.mxu0 %v1652_v4  ;;  %1580 = vmatpush3.bf16.msra.mxu1 %v1653_v5 }
 0x284   :  { %1561 = vmatprep.subr.bf16.mxu0 %v1654_v6  ;;  %1581 = vmatprep.subr.bf16.mxu1 %v1655_v7 }
 0x285   :  { %v684_v13 = vpop.xlane.xlu1 %683 }
 0x286   :  { %1690 = vrcp.f32 %v684_v13 }
 0x287   :  { %1562 = vmatpush3.bf16.msra.mxu0 %v1656_v9  ;;  %1582 = vmatpush3.bf16.msra.mxu1 %v1657_v10 }
 0x288   :  { %1563 = vmatprep.subr.bf16.mxu0 %v1658_v11  ;;  %1583 = vmatprep.subr.bf16.mxu1 %v1659_v12 }
 0x28b   :  { %1564 = vmatpush3.bf16.msra.mxu0 %v1660_v14  ;;  %1584 = vmatpush3.bf16.msra.mxu1 %v1661_v15 }
 0x28c   :  { %v1689_v21 = vpop.eup %1688  ;;  %1565 = vmatprep.subr.bf16.mxu0 %v1662_v16  ;;  %1585 = vmatprep.subr.bf16.mxu1 %v1663_v17 }
 0x28d   :  { %v666_v23 = vmul.f32 %v1689_v21, %v1919_v29  ;;  %v665_v25 = vmul.f32 %v1689_v21, %v1917_v28 }
 0x28f   :  { %1566 = vmatpush3.bf16.msra.mxu0 %v1664_v18  ;;  %1586 = vmatpush3.bf16.msra.mxu1 %v1665_v19  ;;  %v668_v26 = vpack.c.bf16 %v666_v23, %v666_v23  ;;  %v667_v27 = vpack.c.bf16 %v665_v25, %v665_v25 }
 0x290   :  { %v1691_v24 = vpop.eup %1690  ;;  %1587 = vmatprep.subr.bf16.mxu1 %v1666_v22 }
 0x291   :  { %1314 = vmatprep.mubr.bf16.mxu0 %v668_v26  ;;  %v687_v30 = vmul.f32 %v1691_v24, %v1927_v37  ;;  %v686_v31 = vmul.f32 %v1691_v24, %v1925_v36 }
 0x292   :  { %1315 = vmatmul.mubr.bf16.vlgmr.msra.gmra.mrb[12].mxu0 %v667_v27 }
 0x293   :  { %1588 = vmatpush3.bf16.msra.mxu1 %v1667_v20  ;;  %v689_v32 = vpack.c.bf16 %v687_v30, %v687_v30  ;;  %v688_v33 = vpack.c.bf16 %v686_v31, %v686_v31 }
 0x295   :  { %1354 = vmatprep.mubr.bf16.mxu1 %v689_v32 }
 0x296   :  { %1355 = vmatmul.mubr.bf16.vlgmr.msra.gmra.mrb[12].mxu1 %v688_v33 }
 0x345   :  { %v1523_v29 = vpop.f32.mrb[8].mxu0 }
 0x346   :  { %v1524_v28 = vpop.f32.mrb[9].mxu0 }
 0x347   :  { %v1525_v34 = vadd.f32 %v1524_v28, %v1523_v29  ;;  %v1526_v35 = vpop.f32.mrb[10].mxu0 }
 0x348   :  { %v1527_v38 = vpop.f32.mrb[11].mxu0 }
 0x349   :  { %v1545_v39 = vpop.f32.mrb[8].mxu1 }
 0x34a   :  { %v1546_v40 = vpop.f32.mrb[9].mxu1 }
 0x34b   :  { %v1547_v41 = vadd.f32 %v1546_v40, %v1545_v39  ;;  %v1548_v0 = vpop.f32.mrb[10].mxu1 }
 0x34c   :  { %v1549_v42 = vpop.f32.mrb[11].mxu1 }
 0x34d   :  { %v1277_v43 = vadd.f32 %v1547_v41, %v1525_v34 }
 0x365   :  { %v1567_v37 = vpop.f32.mrb[12].mxu0 }
 0x366   :  { %v1568_v44 = vpop.f32.mrb[13].mxu0 }
 0x367   :  { %v1569_v36 = vadd.f32 %v1568_v44, %v1567_v37  ;;  %v1570_v45 = vpop.f32.mrb[14].mxu0 }
 0x368   :  { %v1571_v46 = vpop.f32.mrb[15].mxu0 }
 0x369   :  { %v1317_v47 = vadd.f32 %v1569_v36, %v1277_v43  ;;  %v1589_v48 = vpop.f32.mrb[12].mxu1 }
 0x36a   :  { %v1590_v49 = vpop.f32.mrb[13].mxu1 }
 0x36b   :  { %v1591_v50 = vadd.f32 %v1590_v49, %v1589_v48  ;;  %v1592_v51 = vpop.f32.mrb[14].mxu1 }
 0x36c   :  { %v1593_v52 = vpop.f32.mrb[15].mxu1 }
 0x36d   :  { %v1357_v53 = vadd.f32 %v1591_v50, %v1317_v47 }
 0x36f   :  { %1362 = vst [vmem:[#allocation8] sm:$0xf] %v1357_v53 }
 0x370   :  { %1769 = shalt.err (!%p1766_p0)
}
 0x371   :  { %s1770_s27 = scalar_lea.hbm %s1956_s3, 64 }
 0x372   :  { %p1771_p1 = scmp.ne.s32.totalorder %s1956_s3, %s1770_s27  ;;  %p1774_p2 = scmp.lt.u32.totalorder %s1770_s27, %s1956_s3 }
 0x374   :  { %p1776_p3 = pnand %p1774_p2, %p1771_p1 }
 0x376   :  { %1779 = shalt.err (!%p1776_p3)
}
 0x377   :  { %1372 = dma.vmem_to_hbm [thread:$0]  %s1370_s23, 64, %s1956_s3, [#allocation4]  }
 0x378   :  { %1784 = dma.done.wait [#allocation4], 64  }
 0x379   :  { %1785 = vsyncadd [#allocation4], 4294967232 }
 0x37a   :  { %1376 = vsyncpa [#allocation3], 1 }
 0x37b   :  { %1377 = vsyncpa [#allocation6], 1 }
 0x37c   :  { %1378 = vsyncpa [#allocation4], 1 }

</bundles_post_ra>
